<compile_context>
chip_gen: v5e
topology: v5e:2x2
jax: 0.10.0
libtpu: 0.0.40
codegen_flags: <defaults>
</compile_context>

<pallas_src>
import functools

import jax
import jax.numpy as jnp
from jax import lax
from jax.experimental import pallas as pl
from jax.experimental.pallas import tpu as pltpu


def _mlp_finalize(avg, mx, w1t_ref, w2t_ref, o_ref):
    """Shared MLP over stacked (avg; max) rows, branch sum, sigmoid, write.

    NOTE (invariant): every op here is row-wise, so garbage rows coming from a
    partial batch tile (B % Bb != 0) stay confined to rows Pallas never writes
    back to HBM.  Do NOT add any cross-row (batch-dim) reduction here.
    """
    bb = avg.shape[0]
    pooled = jnp.concatenate([avg, mx], axis=0)               # (2*Bb, C)
    h = jnp.dot(pooled, w1t_ref[...],
                preferred_element_type=jnp.float32)           # (2*Bb, Cr)
    h = jnp.maximum(h, 0.0)                                   # ReLU
    y = jnp.dot(h, w2t_ref[...],
                preferred_element_type=jnp.float32)           # (2*Bb, C)
    out = y[:bb] + y[bb:]                                     # avg-branch + max-branch
    o_ref[...] = jax.nn.sigmoid(out)[:, None, :].astype(o_ref.dtype)


def _ca_single_tile_kernel(x_ref, w1t_ref, w2t_ref, o_ref, *, hw):
    # Whole spatial extent in one block: reduce directly (one XLU pass total).
    xf = x_ref[...].astype(jnp.float32)                       # (Bb, C, HW)
    avg = jnp.sum(xf, axis=-1) * (1.0 / hw)
    mx = jnp.max(xf, axis=-1)
    _mlp_finalize(avg, mx, w1t_ref, w2t_ref, o_ref)


def _ca_multi_tile_kernel(x_ref, w1t_ref, w2t_ref, o_ref, sum_ref, max_ref, *,
                          hw, thw, n_k):
    # x_ref   : (Bb, C, thw)   native dtype, thw % 128 == 0
    # sum_ref : (Bb, C, 128)   f32 running lane-form spatial sum
    # max_ref : (Bb, C, 128)   f32 running lane-form spatial max
    k = pl.program_id(1)

    @pl.when(k == 0)
    def _init():
        sum_ref[...] = jnp.zeros_like(sum_ref)
        max_ref[...] = jnp.full_like(max_ref, -jnp.inf)

    x = x_ref[...].astype(jnp.float32)                        # (Bb, C, thw)
    lane_chunks = thw // 128
    rem = hw - (n_k - 1) * thw            # valid lanes in the LAST tile (static)
    last_needs_mask = rem < thw           # static

    def fold(masked):
        # Fold 128-lane chunks elementwise (VPU only, no cross-lane XLU work).
        limit = rem if masked else thw
        s = None
        m = None
        for j in range(lane_chunks):
            lo = j * 128
            if lo >= limit:
                break                      # fully padded chunk: contributes nothing
            c = x[:, :, lo:lo + 128]
            if masked and lo + 128 > limit:
                lane = lax.broadcasted_iota(jnp.int32, c.shape, 2)
                valid = lane < (limit - lo)
                cs = jnp.where(valid, c, 0.0)
                cm = jnp.where(valid, c, -jnp.inf)
            else:
                cs = c
                cm = c
            s = cs if s is None else s + cs
            m = cm if m is None else jnp.maximum(m, cm)
        sum_ref[...] += s
        max_ref[...] = jnp.maximum(max_ref[...], m)

    if last_needs_mask:
        @pl.when(k == n_k - 1)
        def _last_tile():
            fold(masked=True)

        @pl.when(k != n_k - 1)
        def _full_tile():
            fold(masked=False)
    else:
        fold(masked=False)

    @pl.when(k == n_k - 1)
    def _finalize():
        # Single cross-lane reduce of the 128-lane accumulators.
        avg = jnp.sum(sum_ref[...], axis=-1) * (1.0 / hw)     # true HW, not padded
        mx = jnp.max(max_ref[...], axis=-1)
        _mlp_finalize(avg, mx, w1t_ref, w2t_ref, o_ref)


def channel_attention(x, w1, w2, *, block_bytes=None):
    """x : (B, C, H, W) NCHW (any float dtype, kept native in HBM)
    w1: (C//16, C, 1, 1)  fc1 Conv2d weight (no bias)
    w2: (C, C//16, 1, 1)  fc2 Conv2d weight (no bias)
    returns (B, C, 1, 1) in x.dtype, values in [0, 1]."""
    B, C, H, W = x.shape
    Cr = w1.shape[0]
    HW = H * W

    x_flat = x.reshape(B, C, HW)                              # no dtype upcast
    w1t = jnp.transpose(w1.reshape(Cr, C)).astype(jnp.float32)   # (C, Cr)
    w2t = jnp.transpose(w2.reshape(C, Cr)).astype(jnp.float32)   # (Cr, C)

    itemsize = jnp.dtype(x_flat.dtype).itemsize

    # ---- per-generation VMEM budget ------------------------------------
    try:
        info = pltpu.get_tpu_info()
        vmem_cap = int(getattr(info, "vmem_capacity_bytes", 64 * 1024 * 1024))
    except Exception:  # pragma: no cover - conservative fallback (v7x per-TC)
        vmem_cap = 64 * 1024 * 1024
    if block_bytes is None:
        # ~1/6 of physical VMEM per x block: leaves room for double buffering,
        # the lane-form accumulators, the weights and headroom.
        block_bytes = max(2 * 1024 * 1024, min(16 * 1024 * 1024, vmem_cap // 6))

    # ---- tiling: spatial tile FIRST (DMA contiguity), then batch tile ----
    per_lane_bytes = C * itemsize
    if HW * per_lane_bytes <= block_bytes:
        thw = HW                                   # whole spatial extent, one tile
    else:
        lanes_budget = block_bytes // per_lane_bytes
        thw = min(HW, max(256, (lanes_budget // 128) * 128))  # multiple of 128
    n_ktiles = pl.cdiv(HW, thw)

    per_b_bytes = C * thw * itemsize
    Bb = max(1, min(B, block_bytes // per_b_bytes))
    if B > 1:
        Bb = min(Bb, -(-B // 2))   # keep >= 2 steps on the parallel axis (megacore)
    n_btiles = pl.cdiv(B, Bb)

    if n_ktiles == 1:
        kernel = functools.partial(_ca_single_tile_kernel, hw=HW)
        scratch = []
    else:
        kernel = functools.partial(_ca_multi_tile_kernel,
                                   hw=HW, thw=thw, n_k=n_ktiles)
        scratch = [pltpu.VMEM((Bb, C, 128), jnp.float32),
                   pltpu.VMEM((Bb, C, 128), jnp.float32)]

    # ---- VMEM limit sized from the actual blocks ------------------------
    x_block_bytes = Bb * C * thw * itemsize
    scratch_bytes = (2 * Bb * C * 128 * 4) if n_ktiles > 1 else 0
    weight_bytes = 2 * C * Cr * 4
    out_block_bytes = Bb * C * itemsize
    vmem_needed = (2 * x_block_bytes + scratch_bytes
                   + 2 * (weight_bytes + out_block_bytes) + (2 << 20))
    vmem_limit = int(min(max(vmem_needed, 32 << 20), int(0.95 * vmem_cap)))

    cost = pl.CostEstimate(
        flops=2 * B * C * HW + 8 * B * C * Cr,
        transcendentals=B * C,
        bytes_accessed=B * C * HW * itemsize + 2 * C * Cr * 4 + B * C * itemsize,
    )

    out = pl.pallas_call(
        kernel,
        out_shape=jax.ShapeDtypeStruct((B, 1, C), x.dtype),
        grid_spec=pltpu.PrefetchScalarGridSpec(
            num_scalar_prefetch=0,
            grid=(n_btiles, n_ktiles),                        # reduction axis last
            in_specs=[
                pl.BlockSpec((Bb, C, thw), lambda bi, k: (bi, 0, k)),
                pl.BlockSpec((C, Cr), lambda bi, k: (0, 0)),
                pl.BlockSpec((Cr, C), lambda bi, k: (0, 0)),
            ],
            out_specs=pl.BlockSpec((Bb, 1, C), lambda bi, k: (bi, 0, 0)),
            scratch_shapes=scratch,
        ),
        compiler_params=pltpu.CompilerParams(
            dimension_semantics=("parallel", "arbitrary"),
            vmem_limit_bytes=vmem_limit),
        cost_estimate=cost,
    )(x_flat, w1t, w2t)

    return out.reshape(B, C, 1, 1)


def reference(x, w1, w2):
    """Pure-JAX reference matching the PyTorch forward."""
    B, C, H, W = x.shape
    Cr = w1.shape[0]
    w1m = w1.reshape(Cr, C).astype(jnp.float32)
    w2m = w2.reshape(C, Cr).astype(jnp.float32)

    xf = x.astype(jnp.float32)

    def branch(pooled):                                       # pooled: (B, C)
        h = jnp.maximum(pooled @ w1m.T, 0.0)                  # (B, Cr)
        return h @ w2m.T                                      # (B, C)

    avg = jnp.mean(xf, axis=(2, 3))
    mx = jnp.max(xf, axis=(2, 3))
    out = jax.nn.sigmoid(branch(avg) + branch(mx))
    return out.reshape(B, C, 1, 1).astype(x.dtype)


if __name__ == "__main__":
    # in_planes must be >= 16 so that in_planes // 16 >= 1.
    B, C, H, W = 2, 64, 16, 16
    Cr = C // 16

    key = jax.random.PRNGKey(0)
    kx, k1, k2 = jax.random.split(key, 3)
    x = jax.random.normal(kx, (B, C, H, W), dtype=jnp.float32)
    # Deterministic synthetic weights (Conv2d 1x1, bias=False).
    w1 = jax.random.normal(k1, (Cr, C, 1, 1), dtype=jnp.float32) * 0.1
    w2 = jax.random.normal(k2, (C, Cr, 1, 1), dtype=jnp.float32) * 0.1

    out = jax.block_until_ready(channel_attention(x, w1, w2))
    ref = reference(x, w1, w2)
    assert out.shape == (B, C, 1, 1)
    assert jnp.allclose(out, ref, atol=2e-5, rtol=1e-5), "mismatch vs reference"

    # Second check: small block budget forces the tiled spatial reduction with
    # the lane-masked last tile (HW = 576, thw = 256 -> 3 k-tiles, rem = 64).
    B2, C2, H2, W2 = 3, 32, 24, 24
    Cr2 = C2 // 16
    kx2, k12, k22 = jax.random.split(jax.random.PRNGKey(1), 3)
    x2 = jax.random.normal(kx2, (B2, C2, H2, W2), dtype=jnp.float32)
    w12 = jax.random.normal(k12, (Cr2, C2, 1, 1), dtype=jnp.float32) * 0.1
    w22 = jax.random.normal(k22, (C2, Cr2, 1, 1), dtype=jnp.float32) * 0.1
    out2 = jax.block_until_ready(
        channel_attention(x2, w12, w22, block_bytes=16 * 1024))
    ref2 = reference(x2, w12, w22)
    assert out2.shape == (B2, C2, 1, 1)
    assert jnp.allclose(out2, ref2, atol=2e-5, rtol=1e-5), "mismatch (tiled path)"

    print("KERNEL_OK")
</pallas_src>

<mosaic_0001>
module attributes {stable_mosaic.version = 11 : i64} {
  func.func @_ca_single_tile_kernel(%arg0: i32, %arg1: i32, %arg2: memref<1x64x256xf32, #tpu.memory_space<vmem>>, %arg3: memref<64x4xf32, #tpu.memory_space<vmem>>, %arg4: memref<4x64xf32, #tpu.memory_space<vmem>>, %arg5: memref<1x1x64xf32, #tpu.memory_space<vmem>>) attributes {dimension_semantics = [#tpu.dimension_semantics<parallel>, #tpu.dimension_semantics<arbitrary>], iteration_bounds = array<i64: 2, 1>, scalar_prefetch = 0 : i64, scratch_operands = 0 : i64, tpu.core_type = #tpu.core_type<tc>, window_params = [{transform_indices = @transform_0, window_bounds = array<i64: 1, 64, 256>}, {pipeline_mode = #tpu.pipeline_mode<synchronous>, transform_indices = @transform_1, window_bounds = array<i64: 64, 4>}, {pipeline_mode = #tpu.pipeline_mode<synchronous>, transform_indices = @transform_2, window_bounds = array<i64: 4, 64>}, {transform_indices = @transform_3, window_bounds = array<i64: 1, 1, 64>}]} {
    %c0 = arith.constant 0 : index
    %c0_0 = arith.constant 0 : index
    %c0_1 = arith.constant 0 : index
    %0 = vector.load %arg2[%c0, %c0_0, %c0_1] : memref<1x64x256xf32, #tpu.memory_space<vmem>>, vector<1x64x256xf32>
    %cst = arith.constant dense<0.000000e+00> : vector<1x64xf32>
    %1 = vector.multi_reduction <add>, %0, %cst [2] : vector<1x64x256xf32> to vector<1x64xf32>
    %cst_2 = arith.constant 3.906250e-03 : f32
    %2 = vector.broadcast %cst_2 : f32 to vector<1x64xf32>
    %3 = arith.mulf %1, %2 : vector<1x64xf32>
    %cst_3 = arith.constant dense<0xFF800000> : vector<1x64xf32>
    %4 = vector.multi_reduction <maximumf>, %0, %cst_3 [2] : vector<1x64x256xf32> to vector<1x64xf32>
    %5 = tpu.concatenate %3, %4 in 0 : vector<1x64xf32>, vector<1x64xf32> -> vector<2x64xf32>
    %c0_4 = arith.constant 0 : index
    %c0_5 = arith.constant 0 : index
    %6 = vector.load %arg3[%c0_4, %c0_5] : memref<64x4xf32, #tpu.memory_space<vmem>>, vector<64x4xf32>
    %cst_6 = arith.constant dense<0.000000e+00> : vector<2x4xf32>
    %7 = tpu.matmul %5, %6, %cst_6 {dimension_numbers = #tpu.dot_dimension_numbers<[1], [0], [0], [1], [0, 0, 1, 1], [], []>} : vector<2x64xf32>, vector<64x4xf32>, vector<2x4xf32> -> vector<2x4xf32>
    %cst_7 = arith.constant 0.000000e+00 : f32
    %8 = vector.broadcast %cst_7 : f32 to vector<2x4xf32>
    %9 = arith.maximumf %7, %8 : vector<2x4xf32>
    %c0_8 = arith.constant 0 : index
    %c0_9 = arith.constant 0 : index
    %10 = vector.load %arg4[%c0_8, %c0_9] : memref<4x64xf32, #tpu.memory_space<vmem>>, vector<4x64xf32>
    %cst_10 = arith.constant dense<0.000000e+00> : vector<2x64xf32>
    %11 = tpu.matmul %9, %10, %cst_10 {dimension_numbers = #tpu.dot_dimension_numbers<[1], [0], [0], [1], [0, 0, 1, 1], [], []>} : vector<2x4xf32>, vector<4x64xf32>, vector<2x64xf32> -> vector<2x64xf32>
    %12 = vector.extract_strided_slice %11 {offsets = [0, 0], sizes = [1, 64], strides = [1, 1]} : vector<2x64xf32> to vector<1x64xf32>
    %13 = vector.extract_strided_slice %11 {offsets = [1, 0], sizes = [1, 64], strides = [1, 1]} : vector<2x64xf32> to vector<1x64xf32>
    %14 = arith.addf %12, %13 : vector<1x64xf32>
    %15 = arith.negf %14 : vector<1x64xf32>
    %16 = math.exp %15 : vector<1x64xf32>
    %cst_11 = arith.constant 1.000000e+00 : f32
    %17 = vector.broadcast %cst_11 : f32 to vector<1x64xf32>
    %18 = arith.addf %17, %16 : vector<1x64xf32>
    %19 = arith.divf %17, %18 : vector<1x64xf32>
    %20 = vector.shape_cast %19 : vector<1x64xf32> to vector<1x1x64xf32>
    %c0_12 = arith.constant 0 : index
    %c0_13 = arith.constant 0 : index
    %c0_14 = arith.constant 0 : index
    %21 = vector.load %arg5[%c0_12, %c0_13, %c0_14] : memref<1x1x64xf32, #tpu.memory_space<vmem>>, vector<1x1x64xf32>
    tpu.vector_store %arg5[%c0_12, %c0_13, %c0_14], %20 {strides = array<i32>} : memref<1x1x64xf32, #tpu.memory_space<vmem>>, vector<1x1x64xf32>,
    return
  }
  func.func @transform_0(%arg0: i32, %arg1: i32) -> (i32, i32, i32) {
    %c0_i32 = arith.constant 0 : i32
    %c0_i32_0 = arith.constant 0 : i32
    return %arg0, %c0_i32, %arg1 : i32, i32, i32
  }
  func.func @transform_1(%arg0: i32, %arg1: i32) -> (i32, i32) {
    %c0_i32 = arith.constant 0 : i32
    %c0_i32_0 = arith.constant 0 : i32
    %c0_i32_1 = arith.constant 0 : i32
    return %c0_i32, %c0_i32_0 : i32, i32
  }
  func.func @transform_2(%arg0: i32, %arg1: i32) -> (i32, i32) {
    %c0_i32 = arith.constant 0 : i32
    %c0_i32_0 = arith.constant 0 : i32
    %c0_i32_1 = arith.constant 0 : i32
    return %c0_i32, %c0_i32_0 : i32, i32
  }
  func.func @transform_3(%arg0: i32, %arg1: i32) -> (i32, i32, i32) {
    %c0_i32 = arith.constant 0 : i32
    %c0_i32_0 = arith.constant 0 : i32
    %c0_i32_1 = arith.constant 0 : i32
    return %arg0, %c0_i32, %c0_i32_0 : i32, i32, i32
  }
}

</mosaic_0001>

<bundles_post_ra>
// kernel: tpu_custom_call.1
= control target key start
LH: loop header
LB: loop body
LE: loop exit
PB: predicated region body
PF: predicated region fallthrough
CT: control target
= control target key end

     0   :  { %8 = vsyncpa [#allocation3], 0  ;;  %s913_s0 = inlined_call_operand.hbm [shape: f32[2,64,256], index: 0, kind: input, shape index: {}]   ;;  %s914_s1 = inlined_call_operand.vmem [shape: f32[64,4], index: 1, kind: input, shape index: {}]   ;;  %s915_s2 = inlined_call_operand.vmem [shape: f32[4,64], index: 2, kind: input, shape index: {}]   ;;  %s916_s3 = inlined_call_operand.hbm [shape: f32[2,1,64], index: 3, kind: output, shape index: {}]  }
   0x1   :  { %10 = vsyncpa [#allocation3 + $0x1], 0 }
   0x2   :  { %11 = vsyncpa [#allocation4], 0 }
   0x3   :  { %13 = vsyncpa [#allocation4 + $0x1], 0  ;;  %s739_s12 = smov 0   ;;  %s741_s13 = smov 0  }
   0x4   :  { %s743_s14 = smov 0   ;;  %s745_s15 = smov 0  }
   0x5   :  { %s747_s16 = smov 0   ;;  %s749_s17 = smov 0  }
   0x6 LB: > { %s519_s18 = sadd.s32 4294967295, %s715_s17   ;;  %s520_s19 = sadd.s32 4294967294, %s715_s17   ;;  %s715_s17 = sphi %s749_s17, %s19_s17   ;;  %s711_s16 = sphi %s747_s16, %s925_s16   ;;  %s707_s15 = sphi %s745_s15, %s924_s15   ;;  %s703_s14 = sphi %s743_s14, %s923_s14   ;;  %s699_s13 = sphi %s741_s13, %s922_s13   ;;  %s695_s12 = sphi %s739_s12, %s921_s12  }
   0x7   : > { %s31_s20 = sadd.s32 1, %s711_s16  ;;  %s40_s21 = sadd.s32 1, %s703_s14 }
   0x8   : > { %p33_p0 = scmp.ge.s32.totalorder %s31_s20, 2  ;;  %p47_p1 = scmp.ne.s32.totalorder %s703_s14, %s699_s13 }
   0x9   : > { %p48_p2 = scmp.eq.s32.totalorder %s715_s17, 0  ;;  %p53_p3 = scmp.ne.s32.totalorder %s699_s13, %s695_s12 }
   0xa   : > { %s927_s20 = smov (%p33_p0, %s31_s20), 0  ;;  %p54_p5 = scmp.eq.s32.totalorder %s519_s18, 0 }
   0xb   : > { %p780_p4 = por %p48_p2, %p47_p1  ;;  %s35_s23 = ssub.s32 %s711_s16, %s927_s20 }
   0xc   : > { %p119_p6 = scmp.eq.s32.totalorder %s519_s18, 1  ;;  %p38_p7 = scmp.eq.s32.totalorder %s35_s23, 0 }
   0xd   : > { %p786_p8 = por %p54_p5, %p53_p3  ;;  %p125_p10 = scmp.eq.s32.totalorder %s520_s19, 1 }
   0xe   : > { %p790_p9 = por %p119_p6, %p47_p1  ;;  %p522_p12 = scmp.ge.s32.totalorder %s715_s17, 2 }
   0xf   : > { %s795_s26 = scalar_select %p38_p7, %s703_s14, %s40_s21  }
  0x10   : > { %p797_p11 = por %p125_p10, %p53_p3  ;;  %p547_p13 = scmp.lt.s32.totalorder %s715_s17, 2 }
  0x11   : > { %s151_s28 = sand.u32 1, %s703_s14   ;;  %s534_s30 = sshll.u32 %s711_s16, 7 }
  0x12   : > { %s523_s29 = sshll.u32 %s151_s28, 7  ;;  %s162_s6 = scalar_lea.hbm %s913_s0, %s534_s30 }
  0x13   : > { %s155_s7 = scalar_lea.vmem [#allocation2], %s523_s29  ;;  %s163_s9 = sshll.u32 %s162_s6, 4  ;;  %s164_s9 = int_to_ptr.hbm [resolvable:$true] %s163_s9 }
  0x14   : > { %s165_s8 = sshll.u32 %s155_s7, 4  ;;  %p540_p0 = pnand %p547_p13, %p780_p4  ;;  %s166_s8 = int_to_ptr.vmem [resolvable:$true] %s165_s8 }
  0x15   : > { %p526_p1 = scmp.ge.s32.totalorder %s715_s17, 1  ;;  %s152_s10 = scalar_lea.sflag [#allocation3], %s151_s28 }
  0x16   : > { %s717_s11 = smov 256   ;;  %s718_s18 = smov 16  }
  0x17   : > { %542 = dma.hbm_to_vmem [thread:$0]  (!%p540_p0), %s164_s9, 2048, %s166_s8, %s152_s10, %s717_s11, %s717_s11, %s718_s18  }
  0x18   : > { %p173_p2 = scmp.lt.s32.totalorder %s715_s17, 3 }
  0x1a   : > { %p174_p3 = pnand %p526_p1, %p173_p2 }
  0x1b   : > { %s813_s19 = sand.u32 (!%p174_p3), 1, %s699_s13  }
  0x1c   : > { %177 = sbr.rel (%p174_p3) target bundleno = 487 (0x1e7), region = 32  ;;  %s527_s21 = sshll.u32 (!%p174_p3), %s813_s19, 7 }
  0x1d   : > { %s180_s23 = scalar_lea.sflag (!%p174_p3), [#allocation3], %s813_s19  ;;  %s817_s29 = scalar_lea.vmem (!%p174_p3), [#allocation2], %s527_s21 }
  0x21   : > { %686 = dma.done.wait (%p786_p8), %s180_s23, 2048  }
  0x22   : > { %688 = vsyncadd (%p786_p8), %s180_s23, 4294965248  ;;  %v211_v0 = vld [vmem:[%s817_s29 + $0x20] sm:$0xff]  ;;  %v212_v1 = vld [vmem:[%s817_s29 + $0x28] sm:$0xff]  ;;  %v287_v49 = vlaneseq  ;;  %vm292_vm0 = vcmask 130112   ;;  %vm296_vm1 = vcmask 195712   ;;  %vm300_vm2 = vcmask 261312   ;;  %s441_s4 = scalar_lea.hbm %s916_s3, %s707_s15 }
  0x23   : > { %v207_v2 = vld [vmem:[%s817_s29] sm:$0xff]  ;;  %v229_v3 = vadd.f32 %v212_v1, %v211_v0  ;;  %v208_v4 = vld [vmem:[%s817_s29 + $0x8] sm:$0xff]  ;;  %v213_v7 = vld [vmem:[%s817_s29 + $0x30] sm:$0xff]  ;;  %v261_v18 = vmax.f32 %v211_v0, %v212_v1  ;;  %vm304_vm3 = vcmask 326912   ;;  %vm308_vm4 = vcmask 392512   ;;  %s205_s5 = scalar_lea.vmem [#allocation5], %s813_s19 }
  0x24   : > { %v255_v5 = vmax.f32 %v207_v2, %v208_v4  ;;  %v223_v6 = vadd.f32 %v208_v4, %v207_v2  ;;  %v214_v8 = vld [vmem:[%s817_s29 + $0x38] sm:$0xff]  ;;  %v209_v9 = vld [vmem:[%s817_s29 + $0x10] sm:$0xff]  ;;  %v215_v14 = vld [vmem:[%s817_s29 + $0x40] sm:$0xff]  ;;  %v288_v50 = vand.u32 127, %v287_v49  ;;  %vm312_vm5 = vcmask 458112   ;;  %s443_s6 = sshll.u32 %s205_s5, 4  ;;  %s444_s6 = int_to_ptr.vmem [resolvable:$true] %s443_s6 }
  0x25   : > { %230 = vadd.xlane.f32.xlu1 %v229_v3  ;;  %v210_v10 = vld [vmem:[%s817_s29 + $0x18] sm:$0xff]  ;;  %v232_v11 = vadd.f32 %v214_v8, %v213_v7  ;;  %v216_v15 = vld [vmem:[%s817_s29 + $0x48] sm:$0xff]  ;;  %v217_v16 = vld [vmem:[%s817_s29 + $0x50] sm:$0xff]  ;;  %v264_v24 = vmax.f32 %v213_v7, %v214_v8  ;;  %vm316_vm6 = vcmask 523712   ;;  %vm343_vm7 = vcmask 1040384   ;;  %s445_s7 = sshll.u32 %s441_s4, 4  ;;  %s446_s7 = int_to_ptr.hbm [resolvable:$true] %s445_s7 }
  0x26   : > { %256 = vmax.xlane.f32.xlu2 %v255_v5  ;;  %224 = vadd.xlane.f32.xlu0 %v223_v6  ;;  %v258_v12 = vmax.f32 %v209_v9, %v210_v10  ;;  %v226_v13 = vadd.f32 %v210_v10, %v209_v9  ;;  %v218_v17 = vld [vmem:[%s817_s29 + $0x58] sm:$0xff]  ;;  %v235_v19 = vadd.f32 %v216_v15, %v215_v14  ;;  %v219_v21 = vld [vmem:[%s817_s29 + $0x60] sm:$0xff]  ;;  %v220_v22 = vld [vmem:[%s817_s29 + $0x68] sm:$0xff]  ;;  %v290_v54 = vadd.s32 4294967288, %v288_v50  ;;  %s433_s15 = scalar_lea.sflag [#allocation4], %s813_s19  ;;  %s647_s8 = sshra.s32 %s446_s7, 4  ;;  %s648_s8 = int_to_ptr.hbm [resolvable:$true] %s647_s8 }
  0x27   : > { %v238_v20 = vadd.f32 %v218_v17, %v217_v16  ;;  %v241_v23 = vadd.f32 %v220_v22, %v219_v21  ;;  %v267_v25 = vmax.f32 %v215_v14, %v216_v15  ;;  %v221_v26 = vld [vmem:[%s817_s29 + $0x70] sm:$0xff]  ;;  %v222_v27 = vld [vmem:[%s817_s29 + $0x78] sm:$0xff]  ;;  %v270_v28 = vmax.f32 %v217_v16, %v218_v17  ;;  %v350_v37 = vld [vmem:[%s914_s1 + $0x28] sm:$0xff]  ;;  %s649_s9 = scalar_lea.hbm %s648_s8, 1  ;;  %s653_s18 = scalar_lea.hbm %s916_s3, 2 }
  0x28   : > { %v244_v29 = vadd.f32 %v222_v27, %v221_v26  ;;  %v273_v30 = vmax.f32 %v219_v21, %v220_v22  ;;  %v276_v31 = vmax.f32 %v221_v26, %v222_v27  ;;  %v352_v32 = vld [vmem:[%s914_s1 + $0x38] sm:$0xff]  ;;  %v351_v33 = vld [vmem:[%s914_s1 + $0x30] sm:$0xff]  ;;  %v349_v38 = vld [vmem:[%s914_s1 + $0x20] sm:$0xff]  ;;  %v294_v58 = vadd.s32 4294967280, %v288_v50  ;;  %p650_p4 = scmp.ne.s32.totalorder %s648_s8, %s649_s9  ;;  %p654_p7 = scmp.lt.s32.totalorder %s648_s8, %s916_s3 }
  0x29   : > { %365 = vmatpush.msra.mxu0 %v352_v32  ;;  %v348_v39 = vld [vmem:[%s914_s1 + $0x18] sm:$0xff]  ;;  %v347_v40 = vld [vmem:[%s914_s1 + $0x10] sm:$0xff]  ;;  %v346_v44 = vld [vmem:[%s914_s1 + $0x8] sm:$0xff]  ;;  %v298_v61 = vadd.s32 4294967272, %v288_v50  ;;  %v302_v3 = vadd.s32 4294967264, %v288_v50  ;;  %v306_v7 = vadd.s32 4294967256, %v288_v50  ;;  %p655_p8 = scmp.lt.s32.totalorder %s653_s18, %s649_s9 }
  0x2a   : > { %v345_v45 = vld [vmem:[%s914_s1] sm:$0xff]  ;;  %v310_v8 = vadd.s32 4294967248, %v288_v50  ;;  %v314_v21 = vadd.s32 4294967240, %v288_v50  ;;  %vm353_vm8 = vcmask 523264   ;;  %vm383_vm9 = vcmask 1043456   ;;  %p651_p5 = pnand %p650_p4, %p790_p9 }
  0x2b   : > { %366 = vmatpush.msra.mxu0 %v351_v33  ;;  %vm379_vm10 = vcmask 31744   ;;  %vm430_vm14 = vcmask 516096   ;;  %p656_p10 = por %p655_p8, %p654_p7 }
  0x2c   : > { %p652_p6 = pneg %p651_p5 }
  0x2d   : > { %233 = vadd.xlane.f32.xlu1 %v232_v11  ;;  %367 = vmatpush.msra.mxu0 %v350_v37 }
  0x2e   : > { %259 = vmax.xlane.f32.xlu2 %v258_v12  ;;  %227 = vadd.xlane.f32.xlu0 %v226_v13  ;;  %p657_p13 = pnand %p656_p10, %p652_p6 }
  0x2f   : > { %368 = vmatpush.msra.mxu0 %v349_v38 }
  0x31   : > { %369 = vmatpush.msra.mxu0 %v348_v39 }
  0x33   : > { %370 = vmatpush.msra.mxu0 %v347_v40  ;;  %v378_v40 = vld [vmem:[%s915_s2] sm:$0xf] }
  0x34   : > { %529 = vmatpush.msk.msra.mxu1 %vm383_vm9, %v378_v40 }
  0x35   : > { %262 = vmax.xlane.f32.xlu1 %v261_v18  ;;  %371 = vmatpush.msra.mxu0 %v346_v44 }
  0x36   : > { %236 = vadd.xlane.f32.xlu0 %v235_v19  ;;  %239 = vadd.xlane.f32.xlu2 %v238_v20 }
  0x37   : > { %372 = vmatpush.msra.mxu0 %v345_v45 }
  0x3d   : > { %242 = vadd.xlane.f32.xlu1 %v241_v23 }
  0x3e   : > { %265 = vmax.xlane.f32.xlu0 %v264_v24  ;;  %268 = vmax.xlane.f32.xlu2 %v267_v25 }
  0x45   : > { %271 = vmax.xlane.f32.xlu1 %v270_v28 }
  0x46   : > { %245 = vadd.xlane.f32.xlu0 %v244_v29  ;;  %274 = vmax.xlane.f32.xlu2 %v273_v30 }
  0x4e   : > { %277 = vmax.xlane.f32.xlu0 %v276_v31 }
  0x98   : > { %v231_v34 = vpop.xlane.xlu1 %230 }
  0x99   : > { %v257_v35 = vpop.xlane.xlu2 %256  ;;  %v225_v36 = vpop.xlane.xlu0 %224  ;;  %v249_v59 = vmul.f32 0.00390625, %v231_v34 }
  0x9a   : > { %v247_v53 = vmul.f32 0.00390625, %v225_v36  ;;  %v327_v62 = vperm.slane %v257_v35, %v288_v50 }
  0x9b   : > { %v295_v5 = vperm.slane %v249_v59, %v294_v58 }
  0x9c   : > { %v289_v60 = vperm.slane %v247_v53, %v288_v50 }
  0xa0   : > { %v234_v41 = vpop.xlane.xlu1 %233 }
  0xa1   : > { %v260_v42 = vpop.xlane.xlu2 %259  ;;  %v228_v43 = vpop.xlane.xlu0 %227  ;;  %v250_v63 = vmul.f32 0.00390625, %v234_v41 }
  0xa2   : > { %v248_v51 = vmul.f32 0.00390625, %v228_v43  ;;  %v328_v0 = vperm.slane %v260_v42, %v290_v54 }
  0xa3   : > { %v299_v11 = vperm.slane %v250_v63, %v298_v61 }
  0xa4   : > { %v291_v57 = vperm.slane %v248_v51, %v290_v54  ;;  %v329_v12 = vsel %vm292_vm0, %v328_v0, %v327_v62 }
  0xa6   : > { %v293_v1 = vsel %vm292_vm0, %v291_v57, %v289_v60 }
  0xa7   : > { %v297_v13 = vsel %vm296_vm1, %v295_v5, %v293_v1 }
  0xa8   : > { %v263_v46 = vpop.xlane.xlu1 %262  ;;  %v301_v24 = vsel %vm300_vm2, %v299_v11, %v297_v13 }
  0xa9   : > { %v237_v47 = vpop.xlane.xlu0 %236  ;;  %v240_v48 = vpop.xlane.xlu2 %239  ;;  %v330_v2 = vperm.slane %v263_v46, %v294_v58 }
  0xaa   : > { %v251_v4 = vmul.f32 0.00390625, %v237_v47  ;;  %v252_v14 = vmul.f32 0.00390625, %v240_v48 }
  0xab   : > { %v331_v15 = vsel %vm296_vm1, %v330_v2, %v329_v12 }
  0xac   : > { %v303_v16 = vperm.slane %v251_v4, %v302_v3  ;;  %v307_v25 = vperm.slane %v252_v14, %v306_v7 }
  0xae   : > { %v305_v26 = vsel %vm304_vm3, %v303_v16, %v301_v24 }
  0xaf   : > { %v309_v33 = vsel %vm308_vm4, %v307_v25, %v305_v26 }
  0xb0   : > { %v243_v52 = vpop.xlane.xlu1 %242 }
  0xb1   : > { %v266_v55 = vpop.xlane.xlu0 %265  ;;  %v269_v56 = vpop.xlane.xlu2 %268  ;;  %v253_v17 = vmul.f32 0.00390625, %v243_v52 }
  0xb2   : > { %v332_v6 = vperm.slane %v266_v55, %v298_v61  ;;  %v334_v18 = vperm.slane %v269_v56, %v302_v3 }
  0xb3   : > { %v311_v27 = vperm.slane %v253_v17, %v310_v8 }
  0xb4   : > { %v333_v19 = vsel %vm300_vm2, %v332_v6, %v331_v15 }
  0xb5   : > { %v335_v28 = vsel %vm304_vm3, %v334_v18, %v333_v19  ;;  %v313_v36 = vsel %vm312_vm5, %v311_v27, %v309_v33 }
  0xb8   : > { %v272_v9 = vpop.xlane.xlu1 %271 }
  0xb9   : > { %v246_v10 = vpop.xlane.xlu0 %245  ;;  %v336_v20 = vperm.slane %v272_v9, %v306_v7  ;;  %v275_v23 = vpop.xlane.xlu2 %274 }
  0xba   : > { %v254_v22 = vmul.f32 0.00390625, %v246_v10  ;;  %v338_v29 = vperm.slane %v275_v23, %v310_v8 }
  0xbb   : > { %v337_v30 = vsel %vm308_vm4, %v336_v20, %v335_v28 }
  0xbc   : > { %v315_v31 = vperm.slane %v254_v22, %v314_v21  ;;  %v339_v35 = vsel %vm312_vm5, %v338_v29, %v337_v30 }
  0xbe   : > { %v317_v37 = vsel %vm316_vm6, %v315_v31, %v313_v36 }
  0xc1   : > { %v278_v32 = vpop.xlane.xlu0 %277 }
  0xc2   : > { %v340_v34 = vperm.slane %v278_v32, %v314_v21 }
  0xc4   : > { %v341_v38 = vsel %vm316_vm6, %v340_v34, %v339_v35 }
  0xc5   : > { %v344_v39 = vsel %vm343_vm7, %v317_v37, %v341_v38 }
  0xc6   : > { %528 = vmatmul.msk.f32.vlgmr.msra.gmra.mxu0 %vm353_vm8, %v344_v39 }
 0x143   : > { %v374_v41 = vpop.f32.mrf.mxu0 }
 0x144   : > { %v377_v42 = vmax.f32 %v374_v41, 0.0 }
 0x146   : > { %530 = vmatmul.msk.f32.vlgmr.msra.gmra.mxu1 %vm379_vm10, %v377_v42 }
 0x1c3   : > { %v404_v43 = vpop.f32.mrf.mxu1 }
 0x1c4   : > { %v408_v44 = vrot.slane %v404_v43, 1 }
 0x1c6   : > { %v410_v45 = vadd.f32 %v408_v44, %v404_v43 }
 0x1c8   : > { %v531_v46 = vmul.f32 -1.442695, %v410_v45 }
 0x1ca   : > { %599 = vpow2.f32 %v531_v46 }
 0x1d0   : > { %v600_v47 = vpop.eup %599 }
 0x1d1   : > { %v414_v48 = vadd.f32 1.0, %v600_v47 }
 0x1d3   : > { %601 = vrcp.f32 %v414_v48  ;;  %v426_v52 = vand.u32 2147483648, %v414_v48  ;;  %v424_v54 = vand.u32 2147483647, %v414_v48  ;;  %vm420_vm12 = vweird.f32 %v414_v48 }
 0x1d5   : > { %v427_v56 = vor.u32 1.1754944e-38, %v426_v52  ;;  %vm425_vm15 = vcmp.eq.f32.partialorder %v424_v54, 8.507059e+37 }
 0x1d9   : > { %v602_v49 = vpop.eup %601 }
 0x1da   : > { %v416_v50 = vmul.f32 %v602_v49, %v414_v48  ;;  %vm421_vm11 = vweird.f32 %v602_v49 }
 0x1db   : > { %vm422_vm13 = vmor %vm420_vm12, %vm421_vm11 }
 0x1dc   : > { %v417_v51 = vsub.f32 1.0, %v416_v50 }
 0x1de   : > { %v418_v53 = vmul.f32 %v602_v49, %v417_v51 }
 0x1e0   : > { %v419_v55 = vadd.f32 %v602_v49, %v418_v53 }
 0x1e2   : > { %v423_v57 = vsel %vm422_vm13, %v602_v49, %v419_v55 }
 0x1e3   : > { %v428_v58 = vsel %vm425_vm15, %v427_v56, %v423_v57 }
 0x1e4   : > { %431 = vst.msk [vmem:[%s205_s5] sm:$0x1] %vm430_vm14, %v428_v58 }
 0x1e5   : > { %660 = shalt.err (!%p657_p13)
}
 0x1e6   : > { %537 = dma.vmem_to_hbm [thread:$0]  (%p790_p9), %s444_s6, 16, %s446_s7, %s433_s15  }
 0x1e7 PF: > { %s457_s19 = sand.u32 1, %s695_s12   ;;  %p544_p0 = pnand %p522_p12, %p797_p11 }
 0x1e8   : > { %s458_s29 = scalar_lea.sflag [#allocation4], %s457_s19 }
 0x1e9   : > { %p545_p1 = pneg %p544_p0 }
 0x1eb   : > { %690 = dma.done.wait (%p545_p1), %s458_s29, 16  }
 0x1ec   : > { %692 = vsyncadd (%p545_p1), %s458_s29, 4294967280  ;;  %s19_s17 = sadd.s32 1, %s715_s17   ;;  %s921_s12 = smov %s699_s13 }
 0x1ed   : > { %p16_p2 = scmp.ge.s32.totalorder %s19_s17, 4   ;;  %s922_s13 = smov %s703_s14 }
 0x1ee   : > { %s923_s14 = smov %s795_s26  ;;  %s924_s15 = smov %s711_s16 }
 0x1ef   : > { %s925_s16 = smov %s927_s20  ;;  %18 = sbr.rel (!%p16_p2) target bundleno = 6 (0x6), region = 77 }
 0x1f4   :  { %463 = vsyncpa [#allocation3], 1 }
 0x1f5   :  { %465 = vsyncpa [#allocation3 + $0x1], 1 }
 0x1f6   :  { %466 = vsyncpa [#allocation4], 1 }
 0x1f7   :  { %468 = vsyncpa [#allocation4 + $0x1], 1 }

</bundles_post_ra>
